<compile_context>
chip_gen: v5e
topology: v5e:2x2
jax: 0.10.0
libtpu: 0.0.40
codegen_flags: <defaults>
</compile_context>

<pallas_src>
import functools

import jax
import jax.numpy as jnp
from jax import lax
from jax.experimental import pallas as pl
from jax.experimental.pallas import tpu as pltpu

LANE = 128
SUB_ROWS = 256          # in-kernel compute sub-tile (bounds live vreg ranges)
VMEM_CAP = 44 * 1024 * 1024   # stay well under v7x's 64 MiB/TC


def _round_up(n, m):
    return ((n + m - 1) // m) * m


def _normalize_tile(t):
    """Tile must be a multiple of 16 (bf16 sublanes); if >= SUB_ROWS it must be
    a multiple of SUB_ROWS so the in-kernel sub-tiling divides it evenly."""
    if t >= SUB_ROWS:
        return max(SUB_ROWS, (t // SUB_ROWS) * SUB_ROWS)
    return max(16, _round_up(t, 16))


def _mlp_kernel(x_ref,
                w1_ref, b1_ref,
                w2_ref, b2_ref,
                w3_ref, b3_ref,
                w4_ref, b4_ref,
                o_ref, *, sub_rows, n_sub):
    """Fused 4-layer MLP on one batch tile.

    x arrives as f32 and is cast to the MXU dtype in-kernel; accumulation,
    bias add and ReLU are f32 (VPU).  The batch tile is processed in
    `sub_rows`-row sub-tiles to bound live f32 intermediates.
    """
    cdt = w1_ref.dtype  # MXU operand dtype (bf16)

    def body(s, carry):
        r0 = pl.multiple_of(s * sub_rows, sub_rows)
        xb = x_ref[pl.ds(r0, sub_rows), :].astype(cdt)

        h = jnp.dot(xb, w1_ref[...],
                    preferred_element_type=jnp.float32) + b1_ref[...]
        h = jnp.maximum(h, 0.0)

        h = jnp.dot(h.astype(cdt), w2_ref[...],
                    preferred_element_type=jnp.float32) + b2_ref[...]
        h = jnp.maximum(h, 0.0)

        h = jnp.dot(h.astype(cdt), w3_ref[...],
                    preferred_element_type=jnp.float32) + b3_ref[...]
        h = jnp.maximum(h, 0.0)

        h = jnp.dot(h.astype(cdt), w4_ref[...],
                    preferred_element_type=jnp.float32) + b4_ref[...]

        o_ref[pl.ds(r0, sub_rows), :] = h.astype(o_ref.dtype)
        return carry

    lax.fori_loop(0, n_sub, body, 0, unroll=True)


def predictor_dos_forward(x, params, *, batch_tile=2048,
                          compute_dtype=jnp.bfloat16,
                          out_dtype=jnp.bfloat16,
                          trim_output=True):
    """x: (B, hidden_dim) f32.  params: w1..w4 (in,out) f32, b1..b4 (1,out) f32."""
    B, H = x.shape
    num_dos = params["w4"].shape[1]

    dims = [H,
            params["w1"].shape[1],
            params["w2"].shape[1],
            params["w3"].shape[1],
            num_dos]
    # Only OUTPUT features of each layer are lane-padded; layer-1 input dim
    # stays at its true size H (x is streamed unpadded, cast in-kernel).
    pdims = [H] + [_round_up(d, LANE) for d in dims[1:]]

    # Pad + cast weights/biases once. Zero padding is exact: padded output
    # columns give 0 pre-activations, ReLU(0)=0, and the corresponding rows of
    # the next layer's weight are 0, so nothing leaks into real outputs.
    wb = []
    for layer in range(1, 5):
        w = params[f"w{layer}"]
        b = params[f"b{layer}"]
        fi, fo = pdims[layer - 1], pdims[layer]
        w = jnp.pad(w, ((0, fi - w.shape[0]), (0, fo - w.shape[1]))).astype(compute_dtype)
        b = jnp.pad(b, ((0, 0), (0, fo - b.shape[1]))).astype(jnp.float32)
        wb += [w, b]

    out_itemsize = jnp.dtype(out_dtype).itemsize
    weight_bytes = sum(int(a.size) * a.dtype.itemsize for a in wb)
    max_pdim = max(pdims)

    def vmem_estimate(t):
        sub = min(t, SUB_ROWS)
        bytes_x = t * H * 4 * 2                        # f32 input, double buffered
        bytes_o = t * pdims[-1] * out_itemsize * 2     # output, double buffered
        bytes_live = 4 * sub * max_pdim * 4            # ~4 live f32 intermediates
        return bytes_x + bytes_o + weight_bytes + bytes_live

    # Pick the largest tile that fits the batch and the VMEM budget.
    tile = _normalize_tile(min(_round_up(batch_tile, 16), _round_up(B, 16)))
    while vmem_estimate(tile) > VMEM_CAP and tile > SUB_ROWS:
        tile = _normalize_tile(tile // 2)
    vmem_limit = int(min(48 << 20, max(2 * vmem_estimate(tile), 32 << 20)))

    sub = min(tile, SUB_ROWS)
    n_sub = tile // sub

    # Pad only the batch dimension; x stays f32 (no extra HBM copy of features).
    B_p = _round_up(B, tile)
    x_p = jnp.pad(x, ((0, B_p - B), (0, 0)))
    grid = (B_p // tile,)

    kernel = functools.partial(_mlp_kernel, sub_rows=sub, n_sub=n_sub)

    # Weights/biases: whole-array resident in VMEM (tiny), no per-step DMA.
    weight_specs = [pl.BlockSpec(memory_space=pltpu.MemorySpace.VMEM)] * 8

    out_padded = pl.pallas_call(
        kernel,
        out_shape=jax.ShapeDtypeStruct((B_p, pdims[-1]), out_dtype),
        grid=grid,
        # x block: full feature dim equals the array dim -> (8,128) rule OK.
        # (If xprof ever shows exposed input DMA at very large tiles, add
        #  pipeline_mode=pl.Buffered(3) on this spec.)
        in_specs=[pl.BlockSpec((tile, H), lambda i: (i, 0))] + weight_specs,
        out_specs=pl.BlockSpec((tile, pdims[-1]), lambda i: (i, 0)),
        compiler_params=pltpu.CompilerParams(
            dimension_semantics=("parallel",),
            vmem_limit_bytes=vmem_limit),
    )(x_p, *wb)

    if not trim_output:
        # Consumers that can work on the padded layout avoid an extra HBM pass.
        return out_padded
    return out_padded[:B, :num_dos]


def init_params(key, hidden_dim, Lvp, num_dos):
    """Deterministic synthetic init (PyTorch-style uniform fan-in scaling)."""
    dims = [hidden_dim, Lvp[0], Lvp[1], Lvp[2], num_dos]
    params = {}
    for layer in range(4):
        fan_in, fan_out = dims[layer], dims[layer + 1]
        key, kw, kb = jax.random.split(key, 3)
        bound = 1.0 / jnp.sqrt(fan_in)
        params[f"w{layer + 1}"] = jax.random.uniform(
            kw, (fan_in, fan_out), jnp.float32, -bound, bound)
        params[f"b{layer + 1}"] = jax.random.uniform(
            kb, (1, fan_out), jnp.float32, -bound, bound)
    return params


def reference_forward(x, params, compute_dtype=jnp.bfloat16):
    """Plain-JAX reference mirroring the kernel's bf16-operand / f32-accumulate math."""
    h = x
    for layer in range(1, 5):
        w = params[f"w{layer}"].astype(compute_dtype)
        h = jnp.dot(h.astype(compute_dtype), w,
                    preferred_element_type=jnp.float32) + params[f"b{layer}"]
        if layer < 4:
            h = jnp.maximum(h, 0.0)
    return h


if __name__ == "__main__":
    # Small shapes consistent with the module: batch of hidden_dim-sized
    # feature vectors, MLP widths Lvp, output size num_dos.
    batch = 16
    hidden_dim = 32
    Lvp = (64, 48, 32)
    num_dos = 24

    key = jax.random.PRNGKey(0)
    key, kx = jax.random.split(key)
    x = jax.random.normal(kx, (batch, hidden_dim), jnp.float32)
    params = init_params(key, hidden_dim, Lvp, num_dos)

    out = predictor_dos_forward(x, params)
    out = jax.block_until_ready(out)

    ref = reference_forward(x, params)
    assert out.shape == (batch, num_dos)
    assert jnp.allclose(out.astype(jnp.float32), ref, atol=2e-2, rtol=2e-2), \
        "mismatch vs JAX reference"

    print("KERNEL_OK")
</pallas_src>

<mosaic_0001>
module attributes {stable_mosaic.version = 11 : i64} {
  func.func @_mlp_kernel(%arg0: i32, %arg1: memref<16x32xf32, #tpu.memory_space<vmem>>, %arg2: memref<32x128xbf16, #tpu.memory_space<vmem>>, %arg3: memref<1x128xf32, #tpu.memory_space<vmem>>, %arg4: memref<128x128xbf16, #tpu.memory_space<vmem>>, %arg5: memref<1x128xf32, #tpu.memory_space<vmem>>, %arg6: memref<128x128xbf16, #tpu.memory_space<vmem>>, %arg7: memref<1x128xf32, #tpu.memory_space<vmem>>, %arg8: memref<128x128xbf16, #tpu.memory_space<vmem>>, %arg9: memref<1x128xf32, #tpu.memory_space<vmem>>, %arg10: memref<16x128xbf16, #tpu.memory_space<vmem>>) attributes {dimension_semantics = [#tpu.dimension_semantics<parallel>], iteration_bounds = array<i64: 1>, scalar_prefetch = 0 : i64, scratch_operands = 0 : i64, tpu.core_type = #tpu.core_type<tc>, window_params = [{transform_indices = @transform_0, window_bounds = array<i64: 16, 32>}, {pipeline_mode = #tpu.pipeline_mode<synchronous>, transform_indices = @transform_1, window_bounds = array<i64: 32, 128>}, {pipeline_mode = #tpu.pipeline_mode<synchronous>, transform_indices = @transform_2, window_bounds = array<i64: 1, 128>}, {pipeline_mode = #tpu.pipeline_mode<synchronous>, transform_indices = @transform_3, window_bounds = array<i64: 128, 128>}, {pipeline_mode = #tpu.pipeline_mode<synchronous>, transform_indices = @transform_4, window_bounds = array<i64: 1, 128>}, {pipeline_mode = #tpu.pipeline_mode<synchronous>, transform_indices = @transform_5, window_bounds = array<i64: 128, 128>}, {pipeline_mode = #tpu.pipeline_mode<synchronous>, transform_indices = @transform_6, window_bounds = array<i64: 1, 128>}, {pipeline_mode = #tpu.pipeline_mode<synchronous>, transform_indices = @transform_7, window_bounds = array<i64: 128, 128>}, {pipeline_mode = #tpu.pipeline_mode<synchronous>, transform_indices = @transform_8, window_bounds = array<i64: 1, 128>}, {transform_indices = @transform_9, window_bounds = array<i64: 16, 128>}]} {
    %c0_i32 = arith.constant 0 : i32
    %c16_i32 = arith.constant 16 : i32
    %0 = arith.muli %c0_i32, %c16_i32 : i32
    %1 = tpu.assume_multiple %0, 16 : i32
    %2 = arith.index_cast %1 : i32 to index
    %c0 = arith.constant 0 : index
    %3 = vector.load %arg1[%2, %c0] : memref<16x32xf32, #tpu.memory_space<vmem>>, vector<16x32xf32>
    %4 = arith.truncf %3 : vector<16x32xf32> to vector<16x32xbf16>
    %c0_0 = arith.constant 0 : index
    %c0_1 = arith.constant 0 : index
    %5 = vector.load %arg2[%c0_0, %c0_1] : memref<32x128xbf16, #tpu.memory_space<vmem>>, vector<32x128xbf16>
    %cst = arith.constant dense<0.000000e+00> : vector<16x128xf32>
    %6 = tpu.matmul %4, %5, %cst {dimension_numbers = #tpu.dot_dimension_numbers<[1], [0], [0], [1], [0, 0, 1, 1], [], []>} : vector<16x32xbf16>, vector<32x128xbf16>, vector<16x128xf32> -> vector<16x128xf32>
    %c0_2 = arith.constant 0 : index
    %c0_3 = arith.constant 0 : index
    %7 = vector.load %arg3[%c0_2, %c0_3] : memref<1x128xf32, #tpu.memory_space<vmem>>, vector<1x128xf32>
    %8 = vector.broadcast %7 : vector<1x128xf32> to vector<16x128xf32>
    %9 = arith.addf %6, %8 : vector<16x128xf32>
    %cst_4 = arith.constant 0.000000e+00 : f32
    %10 = vector.broadcast %cst_4 : f32 to vector<16x128xf32>
    %11 = arith.maximumf %9, %10 : vector<16x128xf32>
    %12 = arith.truncf %11 : vector<16x128xf32> to vector<16x128xbf16>
    %c0_5 = arith.constant 0 : index
    %c0_6 = arith.constant 0 : index
    %13 = vector.load %arg4[%c0_5, %c0_6] : memref<128x128xbf16, #tpu.memory_space<vmem>>, vector<128x128xbf16>
    %cst_7 = arith.constant dense<0.000000e+00> : vector<16x128xf32>
    %14 = tpu.matmul %12, %13, %cst_7 {dimension_numbers = #tpu.dot_dimension_numbers<[1], [0], [0], [1], [0, 0, 1, 1], [], []>} : vector<16x128xbf16>, vector<128x128xbf16>, vector<16x128xf32> -> vector<16x128xf32>
    %c0_8 = arith.constant 0 : index
    %c0_9 = arith.constant 0 : index
    %15 = vector.load %arg5[%c0_8, %c0_9] : memref<1x128xf32, #tpu.memory_space<vmem>>, vector<1x128xf32>
    %16 = vector.broadcast %15 : vector<1x128xf32> to vector<16x128xf32>
    %17 = arith.addf %14, %16 : vector<16x128xf32>
    %cst_10 = arith.constant 0.000000e+00 : f32
    %18 = vector.broadcast %cst_10 : f32 to vector<16x128xf32>
    %19 = arith.maximumf %17, %18 : vector<16x128xf32>
    %20 = arith.truncf %19 : vector<16x128xf32> to vector<16x128xbf16>
    %c0_11 = arith.constant 0 : index
    %c0_12 = arith.constant 0 : index
    %21 = vector.load %arg6[%c0_11, %c0_12] : memref<128x128xbf16, #tpu.memory_space<vmem>>, vector<128x128xbf16>
    %cst_13 = arith.constant dense<0.000000e+00> : vector<16x128xf32>
    %22 = tpu.matmul %20, %21, %cst_13 {dimension_numbers = #tpu.dot_dimension_numbers<[1], [0], [0], [1], [0, 0, 1, 1], [], []>} : vector<16x128xbf16>, vector<128x128xbf16>, vector<16x128xf32> -> vector<16x128xf32>
    %c0_14 = arith.constant 0 : index
    %c0_15 = arith.constant 0 : index
    %23 = vector.load %arg7[%c0_14, %c0_15] : memref<1x128xf32, #tpu.memory_space<vmem>>, vector<1x128xf32>
    %24 = vector.broadcast %23 : vector<1x128xf32> to vector<16x128xf32>
    %25 = arith.addf %22, %24 : vector<16x128xf32>
    %cst_16 = arith.constant 0.000000e+00 : f32
    %26 = vector.broadcast %cst_16 : f32 to vector<16x128xf32>
    %27 = arith.maximumf %25, %26 : vector<16x128xf32>
    %28 = arith.truncf %27 : vector<16x128xf32> to vector<16x128xbf16>
    %c0_17 = arith.constant 0 : index
    %c0_18 = arith.constant 0 : index
    %29 = vector.load %arg8[%c0_17, %c0_18] : memref<128x128xbf16, #tpu.memory_space<vmem>>, vector<128x128xbf16>
    %cst_19 = arith.constant dense<0.000000e+00> : vector<16x128xf32>
    %30 = tpu.matmul %28, %29, %cst_19 {dimension_numbers = #tpu.dot_dimension_numbers<[1], [0], [0], [1], [0, 0, 1, 1], [], []>} : vector<16x128xbf16>, vector<128x128xbf16>, vector<16x128xf32> -> vector<16x128xf32>
    %c0_20 = arith.constant 0 : index
    %c0_21 = arith.constant 0 : index
    %31 = vector.load %arg9[%c0_20, %c0_21] : memref<1x128xf32, #tpu.memory_space<vmem>>, vector<1x128xf32>
    %32 = vector.broadcast %31 : vector<1x128xf32> to vector<16x128xf32>
    %33 = arith.addf %30, %32 : vector<16x128xf32>
    %34 = arith.truncf %33 : vector<16x128xf32> to vector<16x128xbf16>
    %35 = arith.index_cast %1 : i32 to index
    %c0_22 = arith.constant 0 : index
    %36 = vector.load %arg10[%35, %c0_22] : memref<16x128xbf16, #tpu.memory_space<vmem>>, vector<16x128xbf16>
    tpu.vector_store %arg10[%35, %c0_22], %34 {strides = array<i32>} : memref<16x128xbf16, #tpu.memory_space<vmem>>, vector<16x128xbf16>,
    %c1_i32 = arith.constant 1 : i32
    return
  }
  func.func @transform_0(%arg0: i32) -> (i32, i32) {
    %c0_i32 = arith.constant 0 : i32
    %c0_i32_0 = arith.constant 0 : i32
    return %arg0, %c0_i32 : i32, i32
  }
  func.func @transform_1(%arg0: i32) -> (i32, i32) {
    %c0_i32 = arith.constant 0 : i32
    %c0_i32_0 = arith.constant 0 : i32
    %c0_i32_1 = arith.constant 0 : i32
    return %c0_i32, %c0_i32_0 : i32, i32
  }
  func.func @transform_2(%arg0: i32) -> (i32, i32) {
    %c0_i32 = arith.constant 0 : i32
    %c0_i32_0 = arith.constant 0 : i32
    %c0_i32_1 = arith.constant 0 : i32
    return %c0_i32, %c0_i32_0 : i32, i32
  }
  func.func @transform_3(%arg0: i32) -> (i32, i32) {
    %c0_i32 = arith.constant 0 : i32
    %c0_i32_0 = arith.constant 0 : i32
    %c0_i32_1 = arith.constant 0 : i32
    return %c0_i32, %c0_i32_0 : i32, i32
  }
  func.func @transform_4(%arg0: i32) -> (i32, i32) {
    %c0_i32 = arith.constant 0 : i32
    %c0_i32_0 = arith.constant 0 : i32
    %c0_i32_1 = arith.constant 0 : i32
    return %c0_i32, %c0_i32_0 : i32, i32
  }
  func.func @transform_5(%arg0: i32) -> (i32, i32) {
    %c0_i32 = arith.constant 0 : i32
    %c0_i32_0 = arith.constant 0 : i32
    %c0_i32_1 = arith.constant 0 : i32
    return %c0_i32, %c0_i32_0 : i32, i32
  }
  func.func @transform_6(%arg0: i32) -> (i32, i32) {
    %c0_i32 = arith.constant 0 : i32
    %c0_i32_0 = arith.constant 0 : i32
    %c0_i32_1 = arith.constant 0 : i32
    return %c0_i32, %c0_i32_0 : i32, i32
  }
  func.func @transform_7(%arg0: i32) -> (i32, i32) {
    %c0_i32 = arith.constant 0 : i32
    %c0_i32_0 = arith.constant 0 : i32
    %c0_i32_1 = arith.constant 0 : i32
    return %c0_i32, %c0_i32_0 : i32, i32
  }
  func.func @transform_8(%arg0: i32) -> (i32, i32) {
    %c0_i32 = arith.constant 0 : i32
    %c0_i32_0 = arith.constant 0 : i32
    %c0_i32_1 = arith.constant 0 : i32
    return %c0_i32, %c0_i32_0 : i32, i32
  }
  func.func @transform_9(%arg0: i32) -> (i32, i32) {
    %c0_i32 = arith.constant 0 : i32
    %c0_i32_0 = arith.constant 0 : i32
    return %arg0, %c0_i32 : i32, i32
  }
}

</mosaic_0001>

<bundles_post_ra>
// kernel: tpu_custom_call.1
= control target key start
LH: loop header
LB: loop body
LE: loop exit
PB: predicated region body
PF: predicated region fallthrough
CT: control target
= control target key end

     0   :  { %14 = vsyncpa [#allocation3], 0  ;;  %s840_s0 = inlined_call_operand.hbm [shape: f32[16,32], index: 0, kind: input, shape index: {}]   ;;  %s841_s1 = inlined_call_operand.hbm [shape: bf16[32,128], index: 1, kind: input, shape index: {}]   ;;  %s842_s2 = inlined_call_operand.vmem [shape: f32[1,128], index: 2, kind: input, shape index: {}]   ;;  %s843_s3 = inlined_call_operand.hbm [shape: bf16[128,128], index: 3, kind: input, shape index: {}]   ;;  %s844_s4 = inlined_call_operand.vmem [shape: f32[1,128], index: 4, kind: input, shape index: {}]   ;;  %s845_s5 = inlined_call_operand.hbm [shape: bf16[128,128], index: 5, kind: input, shape index: {}]   ;;  %s846_s6 = inlined_call_operand.vmem [shape: f32[1,128], index: 6, kind: input, shape index: {}]   ;;  %s847_s7 = inlined_call_operand.hbm [shape: bf16[128,128], index: 7, kind: input, shape index: {}]   ;;  %s848_s8 = inlined_call_operand.vmem [shape: f32[1,128], index: 8, kind: input, shape index: {}]   ;;  %s849_s9 = inlined_call_operand.hbm [shape: bf16[16,128], index: 9, kind: output, shape index: {}]  }
   0x1   :  { %15 = vsyncpa [#allocation6], 0 }
   0x2   :  { %16 = vsyncpa [#allocation9], 0  ;;  %s35_s11 = sshll.u32 %s841_s1, 4  ;;  %s36_s11 = int_to_ptr.hbm [resolvable:$true] %s35_s11 }
   0x3   :  { %17 = vsyncpa [#allocation4], 0  ;;  %s735_s12 = smov [#allocation5]   ;;  %s65_s16 = sshll.u32 %s845_s5, 4  ;;  %s66_s16 = int_to_ptr.hbm [resolvable:$true] %s65_s16 }
   0x4   :  { %s37_s13 = sshll.u32 %s735_s12, 4  ;;  %s736_s17 = smov 64   ;;  %s38_s13 = int_to_ptr.vmem [resolvable:$true] %s37_s13 }
   0x5   :  { %s737_s18 = smov 4   ;;  %s738_s19 = smov [#allocation8]  }
   0x6   :  { %43 = dma.hbm_to_vmem [thread:$0]  %s36_s11, 256, %s38_s13, [#allocation6], %s736_s17, %s736_s17, %s737_s18  }
   0x7   :  { %s67_s20 = sshll.u32 %s738_s19, 4  ;;  %s22_s22 = sshll.u32 %s840_s0, 4  ;;  %s68_s20 = int_to_ptr.vmem [resolvable:$true] %s67_s20  ;;  %s23_s22 = int_to_ptr.hbm [resolvable:$true] %s22_s22 }
   0x8   :  { %73 = dma.hbm_to_vmem [thread:$0]  %s66_s16, 1024, %s68_s20, [#allocation9], %s736_s17, %s736_s17, %s737_s18  }
   0x9   :  { %s739_s5 = smov [#allocation2]   ;;  %s50_s26 = sshll.u32 %s843_s3, 4  ;;  %s51_s26 = int_to_ptr.hbm [resolvable:$true] %s50_s26 }
   0xa   :  { %s24_s23 = sshll.u32 %s739_s5, 4  ;;  %s740_s27 = smov 128   ;;  %s25_s23 = int_to_ptr.vmem [resolvable:$true] %s24_s23 }
   0xb   :  { %s741_s28 = smov 8   ;;  %s742_s29 = smov [#allocation7]  }
   0xc   :  { %30 = dma.hbm_to_vmem [thread:$0]  %s23_s22, 256, %s25_s23, [#allocation3], %s740_s27, %s740_s27, %s741_s28  }
   0xd   :  { %s52_s30 = sshll.u32 %s742_s29, 4  ;;  %s80_s11 = sshll.u32 %s847_s7, 4  ;;  %s53_s30 = int_to_ptr.vmem [resolvable:$true] %s52_s30  ;;  %s81_s11 = int_to_ptr.hbm [resolvable:$true] %s80_s11 }
   0xe   :  { %58 = dma.hbm_to_vmem [thread:$0]  %s51_s26, 1024, %s53_s30, [#allocation6], %s736_s17, %s736_s17, %s737_s18  }
   0xf   :  { %s743_s12 = smov [#allocation10]  }
  0x10   :  { %s82_s13 = sshll.u32 %s743_s12, 4  ;;  %s83_s13 = int_to_ptr.vmem [resolvable:$true] %s82_s13 }
  0x11   :  { %88 = dma.hbm_to_vmem [thread:$0]  %s81_s11, 1024, %s83_s13, [#allocation9], %s736_s17, %s736_s17, %s737_s18  }
  0x12   :  { %727 = dma.done.wait [#allocation3], 256  }
  0x13   :  { %728 = vsyncadd [#allocation3], 4294967040 }
  0x14   :  { %729 = dma.done.wait [#allocation6], 1280  }
  0x15   :  { %730 = vsyncadd [#allocation6], 4294966016 }
  0x16   :  { %731 = dma.done.wait [#allocation9], 2048  }
  0x17   :  { %732 = vsyncadd [#allocation9], 4294965248  ;;  %v539_v0 = vld [vmem:[#allocation5 + $0x8] sm:$0xff]  ;;  %v538_v1 = vld [vmem:[#allocation5] sm:$0xff]  ;;  %vm135_vm0 = vcmask 261120   ;;  %s744_s20 = smov [#allocation11]  }
  0x18   :  { %v547_v2 = vld [vmem:[#allocation7 + $0x38] sm:$0xff]  ;;  %145 = vmatpush.bf16.msra.mxu0 %v539_v0  ;;  %v112_v3 = vld [vmem:[#allocation2] sm:$0xff]  ;;  %v113_v4 = vld [vmem:[#allocation2 + $0x8] sm:$0xff]  ;;  %s416_s21 = sshll.u32 %s744_s20, 4  ;;  %s418_s5 = sshll.u32 %s849_s9, 4  ;;  %s417_s21 = int_to_ptr.vmem [resolvable:$true] %s416_s21  ;;  %s419_s5 = int_to_ptr.hbm [resolvable:$true] %s418_s5 }
  0x19   :  { %224 = vmatpush.bf16.msra.mxu1 %v547_v2  ;;  %v546_v5 = vld [vmem:[#allocation7 + $0x30] sm:$0xff]  ;;  %v114_v6 = vpack.c.bf16 %v113_v4, %v112_v3  ;;  %v545_v7 = vld [vmem:[#allocation7 + $0x28] sm:$0xff]  ;;  %v544_v8 = vld [vmem:[#allocation7 + $0x20] sm:$0xff] }
  0x1a   :  { %v543_v9 = vld [vmem:[#allocation7 + $0x18] sm:$0xff]  ;;  %v542_v10 = vld [vmem:[#allocation7 + $0x10] sm:$0xff]  ;;  %v541_v11 = vld [vmem:[#allocation7 + $0x8] sm:$0xff] }
  0x1b   :  { %v540_v12 = vld [vmem:[#allocation7] sm:$0xff]  ;;  %v555_v13 = vld [vmem:[#allocation8 + $0x38] sm:$0xff]  ;;  %v554_v14 = vld [vmem:[#allocation8 + $0x30] sm:$0xff] }
  0x1c   :  { %146 = vmatpush.bf16.msra.mxu0 %v538_v1  ;;  %309 = vmatpush.bf16.msra.mxu2 %v555_v13  ;;  %v553_v15 = vld [vmem:[#allocation8 + $0x28] sm:$0xff]  ;;  %v552_v16 = vld [vmem:[#allocation8 + $0x20] sm:$0xff]  ;;  %v551_v25 = vld [vmem:[#allocation8 + $0x18] sm:$0xff] }
  0x1d   :  { %225 = vmatpush.bf16.msra.mxu1 %v546_v5  ;;  %v579_v18 = vld [vmem:[%s842_s2] ss:$0 sm:$0xff]  ;;  %v550_v26 = vld [vmem:[#allocation8 + $0x10] sm:$0xff]  ;;  %v549_v27 = vld [vmem:[#allocation8 + $0x8] sm:$0xff] }
  0x1e   :  { %v548_v28 = vld [vmem:[#allocation8] sm:$0xff]  ;;  %v563_v29 = vld [vmem:[#allocation10 + $0x38] sm:$0xff]  ;;  %v562_v30 = vld [vmem:[#allocation10 + $0x30] sm:$0xff] }
  0x1f   :  { %441 = vmatmul.msk.bf16.vlgmr.msra.gmra.mxu0 %vm135_vm0, %v114_v6  ;;  %394 = vmatpush.bf16.msra.mxu3 %v563_v29  ;;  %v561_v31 = vld [vmem:[#allocation10 + $0x28] sm:$0xff]  ;;  %v560_v32 = vld [vmem:[#allocation10 + $0x20] sm:$0xff]  ;;  %v559_v41 = vld [vmem:[#allocation10 + $0x18] sm:$0xff] }
  0x20   :  { %310 = vmatpush.bf16.msra.mxu2 %v554_v14  ;;  %v580_v34 = vld [vmem:[%s844_s4] ss:$0 sm:$0xff]  ;;  %v558_v42 = vld [vmem:[#allocation10 + $0x10] sm:$0xff]  ;;  %v557_v43 = vld [vmem:[#allocation10 + $0x8] sm:$0xff] }
  0x21   :  { %226 = vmatpush.bf16.msra.mxu1 %v545_v7  ;;  %v556_v44 = vld [vmem:[#allocation10] sm:$0xff] }
  0x22   :  { %v581_v46 = vld [vmem:[%s846_s6] ss:$0 sm:$0xff] }
  0x23   :  { %395 = vmatpush.bf16.msra.mxu3 %v562_v30  ;;  %v582_v54 = vld [vmem:[%s848_s8] ss:$0 sm:$0xff] }
  0x24   :  { %311 = vmatpush.bf16.msra.mxu2 %v553_v15 }
  0x25   :  { %227 = vmatpush.bf16.msra.mxu1 %v544_v8 }
  0x27   :  { %396 = vmatpush.bf16.msra.mxu3 %v561_v31 }
  0x28   :  { %312 = vmatpush.bf16.msra.mxu2 %v552_v16 }
  0x29   :  { %228 = vmatpush.bf16.msra.mxu1 %v543_v9 }
  0x2b   :  { %397 = vmatpush.bf16.msra.mxu3 %v560_v32 }
  0x2c   :  { %313 = vmatpush.bf16.msra.mxu2 %v551_v25 }
  0x2d   :  { %229 = vmatpush.bf16.msra.mxu1 %v542_v10 }
  0x2f   :  { %398 = vmatpush.bf16.msra.mxu3 %v559_v41 }
  0x30   :  { %314 = vmatpush.bf16.msra.mxu2 %v550_v26 }
  0x31   :  { %230 = vmatpush.bf16.msra.mxu1 %v541_v11 }
  0x33   :  { %399 = vmatpush.bf16.msra.mxu3 %v558_v42 }
  0x34   :  { %315 = vmatpush.bf16.msra.mxu2 %v549_v27 }
  0x35   :  { %231 = vmatpush.bf16.msra.mxu1 %v540_v12 }
  0x37   :  { %400 = vmatpush.bf16.msra.mxu3 %v557_v43 }
  0x38   :  { %316 = vmatpush.bf16.msra.mxu2 %v548_v28 }
  0x3b   :  { %401 = vmatpush.bf16.msra.mxu3 %v556_v44 }
  0x9c   :  { %v148_v17 = vpop.f32.mrf.mxu0 }
  0x9d   :  { %v149_v19 = vadd.f32 %v579_v18, %v148_v17 }
  0x9f   :  { %v153_v22 = vmax.f32 %v149_v19, 0.0 }
  0xa4   :  { %v150_v20 = vpop.f32.mrf.mxu0 }
  0xa5   :  { %v151_v21 = vadd.f32 %v579_v18, %v150_v20 }
  0xa7   :  { %v154_v23 = vmax.f32 %v151_v21, 0.0 }
  0xa9   :  { %v155_v24 = vpack.c.bf16 %v154_v23, %v153_v22 }
  0xab   :  { %232 = vmatmul.bf16.vlgmr.msra.gmra.mxu1 %v155_v24 }
 0x128   :  { %v233_v33 = vpop.f32.mrf.mxu1 }
 0x129   :  { %v234_v35 = vadd.f32 %v580_v34, %v233_v33 }
 0x12b   :  { %v238_v38 = vmax.f32 %v234_v35, 0.0 }
 0x130   :  { %v235_v36 = vpop.f32.mrf.mxu1 }
 0x131   :  { %v236_v37 = vadd.f32 %v580_v34, %v235_v36 }
 0x133   :  { %v239_v39 = vmax.f32 %v236_v37, 0.0 }
 0x135   :  { %v240_v40 = vpack.c.bf16 %v239_v39, %v238_v38 }
 0x137   :  { %317 = vmatmul.bf16.vlgmr.msra.gmra.mxu2 %v240_v40 }
 0x1ba   :  { %v318_v45 = vpop.f32.mrf.mxu2 }
 0x1bb   :  { %v319_v47 = vadd.f32 %v581_v46, %v318_v45 }
 0x1bd   :  { %v323_v50 = vmax.f32 %v319_v47, 0.0 }
 0x1c2   :  { %v320_v48 = vpop.f32.mrf.mxu2 }
 0x1c3   :  { %v321_v49 = vadd.f32 %v581_v46, %v320_v48 }
 0x1c5   :  { %v324_v51 = vmax.f32 %v321_v49, 0.0 }
 0x1c7   :  { %v325_v52 = vpack.c.bf16 %v324_v51, %v323_v50 }
 0x1c9   :  { %402 = vmatmul.bf16.vlgmr.msra.gmra.mxu3 %v325_v52 }
 0x24c   :  { %v403_v53 = vpop.f32.mrf.mxu3 }
 0x24d   :  { %v404_v56 = vadd.f32 %v582_v54, %v403_v53 }
 0x254   :  { %v405_v55 = vpop.f32.mrf.mxu3 }
 0x255   :  { %v406_v57 = vadd.f32 %v582_v54, %v405_v55 }
 0x257   :  { %v567_v58 = vpack.c.bf16 %v406_v57, %v404_v56 }
 0x259   :  { %568 = vst [vmem:[#allocation11] sm:$0xff] %v567_v58  }
 0x25a   :  { %424 = dma.vmem_to_hbm [thread:$0]  %s417_s21, 128, %s419_s5, [#allocation4], %s736_s17, %s736_s17, %s737_s18  }
 0x25b   :  { %733 = dma.done.wait [#allocation4], 128  }
 0x25c   :  { %734 = vsyncadd [#allocation4], 4294967168 }
 0x25d   :  { %429 = vsyncpa [#allocation3], 1 }
 0x25e   :  { %430 = vsyncpa [#allocation6], 1 }
 0x25f   :  { %431 = vsyncpa [#allocation9], 1 }
 0x260   :  { %432 = vsyncpa [#allocation4], 1 }

</bundles_post_ra>
